<compile_context>
chip_gen: v6e
topology: v6e:2x2x1
jax: 0.10.0
libtpu: 0.0.40
codegen_flags: <defaults>
</compile_context>

<pallas_src>
import functools
import math

import jax
import jax.numpy as jnp
from jax.experimental import pallas as pl
from jax.experimental.pallas import tpu as pltpu

# Preferred lane-dense widths (multiples of 128, widest first -> unmasked vst).
_LANE_WIDTHS = (4096, 2048, 1024, 512, 256, 128)
_TARGET_BLOCK_BYTES = 4 << 20   # ~4 MiB per block buffer (2 in + 2 out bufs = 16 MiB)
_MIN_SPLIT_BYTES = 2 << 20      # never shrink blocks below 2 MiB when evening the grid
_VMEM_LIMIT_BYTES = 48 << 20    # > v5e's 16 MiB scoped default, < v7x's 64 MiB physical


def _amp_to_db_kernel(x_ref, o_ref, *, min_level, scale_a, offset_b, max_abs):
    # out = clip(A * ln(max(x, min_level)) + B, -M, M)
    x = x_ref[...].astype(jnp.float32)
    y = scale_a * jnp.log(jnp.maximum(x, min_level)) + offset_b
    o_ref[...] = jnp.clip(y, -max_abs, max_abs).astype(o_ref.dtype)


def _choose_cols(n):
    """Pick a lane dim `cols` such that n == rows * cols exactly (zero-copy reshape)."""
    for c in _LANE_WIDTHS:                 # lane-dense, unmasked stores
        if n % c == 0:
            return c
    # Exact divisor that isn't a multiple of 128: block last dim == full dim is
    # still legal (stores get masked) and it avoids any pad / slice-back HBM pass.
    for c in range(min(n, 4096), 15, -1):
        if n % c == 0:
            return c
    return None


class IAmplitudeToDBPallas:
    def __init__(self, min_level_db, ref_level_db, max_abs_value):
        self.min_level_db = float(min_level_db)
        self.ref_level_db = float(ref_level_db)
        self.max_abs_value = float(max_abs_value)
        # Host-side constant folding:
        #   S = (20/ln10) * ln(max(x, min_level)) - ref_level_db
        #   y = k*(S - min_level_db) - M,   k = 2*M / (-min_level_db)
        # =>  y = A * ln(max(x, min_level)) + B
        self.min_level = 10.0 ** (self.min_level_db / 20.0)
        k = 2.0 * self.max_abs_value / (-self.min_level_db)
        self.scale_a = k * 20.0 / math.log(10.0)
        self.offset_b = (-k * (self.ref_level_db + self.min_level_db)
                         - self.max_abs_value)

    def __call__(self, x):
        orig_shape = x.shape
        dtype = x.dtype
        n = int(x.size)
        if n == 0:
            return x

        itemsize = jnp.dtype(dtype).itemsize
        # sublane multiple scales with packing: f32 -> 8, bf16 -> 16, int8/fp8 -> 32
        sub = 8 * max(1, 4 // max(1, itemsize))

        cols = _choose_cols(n)
        if cols is not None:
            pad = 0
            xf = x.reshape(-1)
        else:
            # Last-resort fallback (e.g. huge prime n): pad to a 128 multiple.
            # Costs one extra HBM pass each way, but essentially never hit.
            cols = 128
            pad = (-n) % cols
            # pad value 1.0 -> log(1)=0, harmless; padded lanes are discarded
            xf = jnp.pad(x.reshape(-1), (0, pad), constant_values=1.0)

        rows = (n + pad) // cols
        x2d = xf.reshape(rows, cols)

        # ---- block sizing by BYTES, not rows --------------------------------
        bytes_per_row = cols * itemsize
        rows_target = max(1, _TARGET_BLOCK_BYTES // bytes_per_row)
        if rows <= rows_target or rows <= sub:
            tile_rows = rows                       # whole slab in one block
        else:
            tile_rows = max(sub, (rows_target // sub) * sub)
            steps = -(-rows // tile_rows)
            # Best-effort even step count (balances v7x's 2 TensorCores); only
            # applied when blocks stay >= 2 MiB, where the extra grid step is
            # also free on single-TC v5e/v6e.
            if steps > 1 and steps % 2 == 1:
                alt = -(-rows // (steps + 1))
                alt = -(-alt // sub) * sub
                if sub <= alt < tile_rows and alt * bytes_per_row >= _MIN_SPLIT_BYTES:
                    tile_rows = alt

        grid = (pl.cdiv(rows, tile_rows),)

        kernel = functools.partial(
            _amp_to_db_kernel,
            min_level=self.min_level,
            scale_a=self.scale_a,
            offset_b=self.offset_b,
            max_abs=self.max_abs_value,
        )

        cost = pl.CostEstimate(
            flops=5 * n,
            transcendentals=n,
            bytes_accessed=2 * n * itemsize,
        )

        out2d = pl.pallas_call(
            kernel,
            out_shape=jax.ShapeDtypeStruct((rows, cols), dtype),
            grid_spec=pl.GridSpec(
                grid=grid,
                in_specs=[pl.BlockSpec((tile_rows, cols), lambda i: (i, 0))],
                out_specs=pl.BlockSpec((tile_rows, cols), lambda i: (i, 0)),
            ),
            compiler_params=pltpu.CompilerParams(
                dimension_semantics=("parallel",),
                vmem_limit_bytes=_VMEM_LIMIT_BYTES,
            ),
            cost_estimate=cost,
        )(x2d)

        if pad:
            return out2d.reshape(-1)[:n].reshape(orig_shape)
        return out2d.reshape(orig_shape)


def _reference(x, min_level_db, ref_level_db, max_abs_value):
    min_level = 10.0 ** (min_level_db / 20.0)
    s = 20.0 * jnp.log10(jnp.maximum(x, min_level)) - ref_level_db
    y = (2.0 * max_abs_value * ((s - min_level_db) / (-min_level_db))
         - max_abs_value)
    return jnp.clip(y, -max_abs_value, max_abs_value)


if __name__ == "__main__":
    # typical Wav2Lip audio hparams
    min_level_db = -100.0
    ref_level_db = 20.0
    max_abs_value = 4.0

    mod = IAmplitudeToDBPallas(min_level_db, ref_level_db, max_abs_value)
    key = jax.random.PRNGKey(0)

    # NCHW spectrogram-like magnitudes (non-negative amplitudes), 128-aligned n
    x = jax.random.uniform(key, (2, 4, 16, 16), dtype=jnp.float32,
                           minval=0.0, maxval=2.0)
    out = jax.block_until_ready(mod(x))
    ref = _reference(x, min_level_db, ref_level_db, max_abs_value)
    assert out.shape == x.shape and out.dtype == x.dtype
    assert jnp.allclose(out, ref, atol=1e-4, rtol=1e-4), "mismatch vs reference"

    # mel-spectrogram-like ragged shape (n % 128 != 0) -> exact-divisor path, no padding
    x2 = jax.random.uniform(jax.random.PRNGKey(1), (80, 23), dtype=jnp.float32,
                            minval=0.0, maxval=2.0)
    out2 = jax.block_until_ready(mod(x2))
    ref2 = _reference(x2, min_level_db, ref_level_db, max_abs_value)
    assert out2.shape == x2.shape and out2.dtype == x2.dtype
    assert jnp.allclose(out2, ref2, atol=1e-4, rtol=1e-4), "mismatch vs reference (ragged)"

    print("KERNEL_OK")
</pallas_src>

<mosaic_0001>
module attributes {stable_mosaic.version = 11 : i64} {
  func.func @_amp_to_db_kernel(%arg0: i32, %arg1: memref<1x2048xf32, #tpu.memory_space<vmem>>, %arg2: memref<1x2048xf32, #tpu.memory_space<vmem>>) attributes {dimension_semantics = [#tpu.dimension_semantics<parallel>], iteration_bounds = array<i64: 1>, scalar_prefetch = 0 : i64, scratch_operands = 0 : i64, tpu.core_type = #tpu.core_type<tc>, window_params = [{transform_indices = @transform_0, window_bounds = array<i64: 1, 2048>}, {transform_indices = @transform_1, window_bounds = array<i64: 1, 2048>}]} {
    %c0 = arith.constant 0 : index
    %c0_0 = arith.constant 0 : index
    %0 = vector.load %arg1[%c0, %c0_0] : memref<1x2048xf32, #tpu.memory_space<vmem>>, vector<1x2048xf32>
    %cst = arith.constant 9.99999974E-6 : f32
    %1 = vector.broadcast %cst : f32 to vector<1x2048xf32>
    %2 = arith.maximumf %0, %1 : vector<1x2048xf32>
    %3 = math.log %2 : vector<1x2048xf32>
    %cst_1 = arith.constant 0.694871187 : f32
    %4 = vector.broadcast %cst_1 : f32 to vector<1x2048xf32>
    %5 = arith.mulf %4, %3 : vector<1x2048xf32>
    %cst_2 = arith.constant 2.400000e+00 : f32
    %6 = vector.broadcast %cst_2 : f32 to vector<1x2048xf32>
    %7 = arith.addf %5, %6 : vector<1x2048xf32>
    %cst_3 = arith.constant -4.000000e+00 : f32
    %cst_4 = arith.constant 4.000000e+00 : f32
    %8 = vector.broadcast %cst_3 : f32 to vector<1x2048xf32>
    %9 = arith.maximumf %8, %7 : vector<1x2048xf32>
    %10 = vector.broadcast %cst_4 : f32 to vector<1x2048xf32>
    %11 = arith.minimumf %10, %9 : vector<1x2048xf32>
    %c0_5 = arith.constant 0 : index
    %c0_6 = arith.constant 0 : index
    %12 = vector.load %arg2[%c0_5, %c0_6] : memref<1x2048xf32, #tpu.memory_space<vmem>>, vector<1x2048xf32>
    tpu.vector_store %arg2[%c0_5, %c0_6], %11 {strides = array<i32>} : memref<1x2048xf32, #tpu.memory_space<vmem>>, vector<1x2048xf32>,
    return
  }
  func.func @transform_0(%arg0: i32) -> (i32, i32) {
    %c0_i32 = arith.constant 0 : i32
    %c0_i32_0 = arith.constant 0 : i32
    return %arg0, %c0_i32 : i32, i32
  }
  func.func @transform_1(%arg0: i32) -> (i32, i32) {
    %c0_i32 = arith.constant 0 : i32
    %c0_i32_0 = arith.constant 0 : i32
    return %arg0, %c0_i32 : i32, i32
  }
}

</mosaic_0001>

<bundles_post_ra>
// kernel: tpu_custom_call.1
= control target key start
LH: loop header
LB: loop body
LE: loop exit
PB: predicated region body
PF: predicated region fallthrough
CT: control target
= control target key end

     0   :  { %6 = vsyncpa [#allocation3], 0  ;;  %s124_s0 = inlined_call_operand.hbm [shape: f32[1,2048], index: 0, kind: input, shape index: {}]   ;;  %s125_s1 = inlined_call_operand.hbm [shape: f32[1,2048], index: 1, kind: output, shape index: {}]  }
   0x1   :  { %7 = vsyncpa [#allocation4], 0  ;;  %s106_s6 = smov [#allocation2]  }
   0x2   :  { %s14_s7 = sshll.u32 %s106_s6, 4  ;;  %s15_s7 = int_to_ptr.vmem [resolvable:$true] %s14_s7 }
   0x3   :  { %s70_s8 = scalar_lea.vmem %s15_s7, 256  ;;  %p75_p1 = scmp.lt.s32.totalorder %s15_s7, %s15_s7 }
   0x4   :  { %p71_p0 = scmp.ne.s32.totalorder %s15_s7, %s70_s8  ;;  %p76_p2 = scmp.lt.s32.totalorder %s70_s8, %s70_s8 }
   0x6   :  { %p77_p3 = por %p76_p2, %p75_p1 }
   0x8   :  { %p78_p4 = pnand %p77_p3, %p71_p0 }
   0xa   :  { %81 = shalt.err (!%p78_p4)
}
   0xb   :  { %17 = dma.hbm_to_vmem [thread:$0]  %s124_s0, 256, %s15_s7, [#allocation3]  }
   0xc   :  { %102 = dma.done.wait [#allocation3], 256  }
   0xd   :  { %103 = vsyncadd [#allocation3], 4294967040  ;;  %v21_v0 = vld [vmem:[#allocation2] sm:$0xff]  ;;  %v22_v1 = vld [vmem:[#allocation2 + $0x8] sm:$0xff]  ;;  %s107_s11 = smov [#allocation5]  }
   0xe   :  { %v23_v2 = vmax.f32 %v21_v0, 1e-05  ;;  %v24_v3 = vmax.f32 %v22_v1, 1e-05  ;;  %s45_s12 = sshll.u32 %s107_s11, 4  ;;  %s46_s12 = int_to_ptr.vmem [resolvable:$true] %s45_s12 }
   0xf   :  { %s82_s0 = scalar_lea.vmem %s46_s12, 256  ;;  %p87_p6 = scmp.lt.s32.totalorder %s46_s12, %s46_s12 }
  0x10   :  { %58 = vlog2.f32 %v23_v2  ;;  %p83_p5 = scmp.ne.s32.totalorder %s46_s12, %s82_s0  ;;  %p88_p7 = scmp.lt.s32.totalorder %s82_s0, %s82_s0 }
  0x11   :  { %60 = vlog2.f32 %v24_v3 }
  0x12   :  { %p89_p8 = por %p88_p7, %p87_p6 }
  0x14   :  { %p90_p9 = pnand %p89_p8, %p83_p5 }
  0x1d   :  { %v59_v4 = vpop.eup %58 }
  0x1e   :  { %v61_v5 = vpop.eup %60  ;;  %v26_v6 = vmul.f32 0.6931472, %v59_v4 }
  0x1f   :  { %v28_v7 = vmul.f32 0.6931472, %v61_v5 }
  0x20   :  { %v29_v8 = vmul.f32 0.6948712, %v26_v6 }
  0x21   :  { %v30_v9 = vmul.f32 0.6948712, %v28_v7 }
  0x22   :  { %v31_v10 = vadd.f32 2.4, %v29_v8 }
  0x23   :  { %v32_v11 = vadd.f32 2.4, %v30_v9 }
  0x24   :  { %v54_v12 = vclamps-f32 %v31_v10, 4.0 }
  0x25   :  { %v55_v13 = vclamps-f32 %v32_v11, 4.0 }
  0x26   :  { %37 = vst [vmem:[#allocation5] sm:$0xff] %v54_v12 }
  0x27   :  { %38 = vst [vmem:[#allocation5 + $0x8] sm:$0xff] %v55_v13 }
  0x28   :  { %93 = shalt.err (!%p90_p9)
}
  0x29   :  { %48 = dma.vmem_to_hbm [thread:$0]  %s46_s12, 256, %s125_s1, [#allocation4]  }
  0x2a   :  { %104 = dma.done.wait [#allocation4], 256  }
  0x2b   :  { %105 = vsyncadd [#allocation4], 4294967040 }
  0x2c   :  { %52 = vsyncpa [#allocation3], 1 }
  0x2d   :  { %53 = vsyncpa [#allocation4], 1 }

</bundles_post_ra>
